<compile_context>
chip_gen: v5e
topology: v5e:2x2
jax: 0.10.0
libtpu: 0.0.40
codegen_flags: <defaults>
</compile_context>

<pallas_src>
import jax
import jax.numpy as jnp
from jax.experimental import pallas as pl
from jax.experimental.pallas import tpu as pltpu

_LANE = 128              # vreg lane width; last dim of the slab
_BLOCK_BYTES = 4 << 20   # ~4 MiB per block (per the perf review)


def _make_vq_kernel(coef):
    """Build an elementwise kernel with the scalar coefficient baked in."""
    coef = float(coef)

    def _vq_kernel(q_ref, o_ref):
        # Compute in f32 regardless of storage dtype; cast on store.
        x = q_ref[...].astype(jnp.float32)
        o_ref[...] = (coef * (1.0 - jnp.cos(x))).astype(o_ref.dtype)

    return _vq_kernel


def _choose_block_rows(rows, itemsize):
    """Pick a row-block size: ~4 MiB, sublane-aligned, and >= 2 grid steps."""
    # Sublane alignment so a ragged last block is still legal: f32 -> 8,
    # bf16 -> 16, int8/fp8 -> 32.
    mult = max(8, 32 // int(itemsize))
    target = max(mult, _BLOCK_BYTES // (_LANE * int(itemsize)))
    if rows < 2 * mult:
        # Too small to split into two aligned blocks; one full-extent block
        # (block dim == array dim satisfies the (8,128) rule).
        return rows
    # At least 2 blocks so both v7x TensorCores get work; otherwise one block
    # per ~4 MiB byte budget.
    num_blocks = max(2, pl.cdiv(rows, target))
    br = pl.cdiv(rows, num_blocks)
    br = ((br + mult - 1) // mult) * mult
    return min(br, rows)


def vq_forward(q, m, l, g):
    """Pallas implementation of Vq.forward: m * g * l * (1 - cos(q))."""
    # NOTE: m/l/g are assumed to be plain Python scalars (as in the module's
    # __init__); the coefficient is baked into the compiled kernel.
    coef = float(m) * float(g) * float(l)
    orig_shape = q.shape
    orig_dtype = q.dtype

    n = q.size
    if n == 0:
        return q

    flat = q.reshape(-1)
    n_main = (n // _LANE) * _LANE      # part handled by the kernel
    tail = n - n_main                  # < 128 leftover elements (plain jnp)

    main_out = None
    if n_main:
        rows = n_main // _LANE
        q2d = flat[:n_main].reshape(rows, _LANE)
        itemsize = jnp.dtype(orig_dtype).itemsize

        br = _choose_block_rows(rows, itemsize)
        grid = (pl.cdiv(rows, br),)

        out2d = pl.pallas_call(
            _make_vq_kernel(coef),
            out_shape=jax.ShapeDtypeStruct((rows, _LANE), orig_dtype),
            grid=grid,
            in_specs=[pl.BlockSpec((br, _LANE), lambda i: (i, 0))],
            out_specs=pl.BlockSpec((br, _LANE), lambda i: (i, 0)),
            compiler_params=pltpu.CompilerParams(
                dimension_semantics=("parallel",),   # shard rows across TCs
                vmem_limit_bytes=32 * 1024 * 1024,   # headroom on v5e default
            ),
            cost_estimate=pl.CostEstimate(
                flops=4 * n_main,
                transcendentals=n_main,
                bytes_accessed=2 * n_main * itemsize,
            ),
        )(q2d)
        main_out = out2d.reshape(-1)

    if tail:
        tail_x = flat[n_main:].astype(jnp.float32)
        tail_out = (coef * (1.0 - jnp.cos(tail_x))).astype(orig_dtype)
        out = tail_out if main_out is None else jnp.concatenate([main_out, tail_out])
    else:
        out = main_out

    return out.reshape(orig_shape)


if __name__ == "__main__":
    # Deterministic scalar "parameters" (module __init__ takes m, l, g scalars).
    m, l, g = 1.5, 0.7, 9.81

    key = jax.random.PRNGKey(0)
    q = jax.random.normal(key, (2, 4, 16, 16), dtype=jnp.float32)

    out = vq_forward(q, m, l, g)
    out = jax.block_until_ready(out)

    # Reference check in plain JAX.
    ref = m * g * l * (1.0 - jnp.cos(q))
    assert out.shape == q.shape
    assert out.dtype == q.dtype
    assert jnp.allclose(out, ref, atol=1e-5, rtol=1e-5)

    # bf16 input, larger shape (exercises the multi-block "parallel" path and
    # dtype-aware block sizing).
    q_bf16 = jax.random.normal(jax.random.PRNGKey(1), (3, 5, 64, 128),
                               dtype=jnp.float32).astype(jnp.bfloat16)
    out_bf16 = jax.block_until_ready(vq_forward(q_bf16, m, l, g))
    ref_bf16 = (m * g * l * (1.0 - jnp.cos(q_bf16.astype(jnp.float32)))
                ).astype(jnp.bfloat16)
    assert out_bf16.shape == q_bf16.shape
    assert out_bf16.dtype == jnp.bfloat16
    assert jnp.allclose(out_bf16.astype(jnp.float32),
                        ref_bf16.astype(jnp.float32), atol=3e-2, rtol=3e-2)

    # Non-multiple-of-128 element count (exercises the <128-element tail path,
    # no padding / slicing round trips).
    q_odd = jax.random.normal(jax.random.PRNGKey(2), (7, 37), dtype=jnp.float32)
    out_odd = jax.block_until_ready(vq_forward(q_odd, m, l, g))
    ref_odd = m * g * l * (1.0 - jnp.cos(q_odd))
    assert out_odd.shape == q_odd.shape
    assert jnp.allclose(out_odd, ref_odd, atol=1e-5, rtol=1e-5)

    print("KERNEL_OK")
</pallas_src>

<mosaic_0001>
module attributes {stable_mosaic.version = 11 : i64} {
  func.func @_vq_kernel(%arg0: i32, %arg1: memref<8x128xf32, #tpu.memory_space<vmem>>, %arg2: memref<8x128xf32, #tpu.memory_space<vmem>>) attributes {dimension_semantics = [#tpu.dimension_semantics<parallel>], iteration_bounds = array<i64: 2>, scalar_prefetch = 0 : i64, scratch_operands = 0 : i64, tpu.core_type = #tpu.core_type<tc>, window_params = [{transform_indices = @transform_0, window_bounds = array<i64: 8, 128>}, {transform_indices = @transform_1, window_bounds = array<i64: 8, 128>}]} {
    %c0 = arith.constant 0 : index
    %c0_0 = arith.constant 0 : index
    %0 = vector.load %arg1[%c0, %c0_0] : memref<8x128xf32, #tpu.memory_space<vmem>>, vector<8x128xf32>
    %1 = math.cos %0 : vector<8x128xf32>
    %cst = arith.constant 1.000000e+00 : f32
    %2 = vector.broadcast %cst : f32 to vector<8x128xf32>
    %3 = arith.subf %2, %1 : vector<8x128xf32>
    %cst_1 = arith.constant 1.030050e+01 : f32
    %4 = vector.broadcast %cst_1 : f32 to vector<8x128xf32>
    %5 = arith.mulf %4, %3 : vector<8x128xf32>
    %c0_2 = arith.constant 0 : index
    %c0_3 = arith.constant 0 : index
    %6 = vector.load %arg2[%c0_2, %c0_3] : memref<8x128xf32, #tpu.memory_space<vmem>>, vector<8x128xf32>
    tpu.vector_store %arg2[%c0_2, %c0_3], %5 {strides = array<i32>} : memref<8x128xf32, #tpu.memory_space<vmem>>, vector<8x128xf32>,
    return
  }
  func.func @transform_0(%arg0: i32) -> (i32, i32) {
    %c0_i32 = arith.constant 0 : i32
    %c0_i32_0 = arith.constant 0 : i32
    return %arg0, %c0_i32 : i32, i32
  }
  func.func @transform_1(%arg0: i32) -> (i32, i32) {
    %c0_i32 = arith.constant 0 : i32
    %c0_i32_0 = arith.constant 0 : i32
    return %arg0, %c0_i32 : i32, i32
  }
}

</mosaic_0001>

<bundles_post_ra>
// kernel: tpu_custom_call.1
= control target key start
LH: loop header
LB: loop body
LE: loop exit
PB: predicated region body
PF: predicated region fallthrough
CT: control target
= control target key end

     0   :  { %6 = vsyncpa [#allocation3], 0  ;;  %s746_s0 = inlined_call_operand.hbm [shape: f32[16,128], index: 0, kind: input, shape index: {}]   ;;  %s747_s1 = inlined_call_operand.hbm [shape: f32[16,128], index: 1, kind: output, shape index: {}]  }
   0x1   :  { %8 = vsyncpa [#allocation3 + $0x1], 0 }
   0x2   :  { %9 = vsyncpa [#allocation4], 0 }
   0x3   :  { %11 = vsyncpa [#allocation4 + $0x1], 0  ;;  %s561_s6 = smov 0   ;;  %s563_s7 = smov 0  }
   0x4   :  { %s565_s8 = smov 0   ;;  %s567_s9 = smov 0  }
   0x5 LB: > { %s582_s10 = sadd.s32 4294967295, %s542_s9   ;;  %s378_s11 = sadd.s32 4294967294, %s542_s9   ;;  %s542_s9 = sphi %s567_s9, %s759_s9   ;;  %s538_s8 = sphi %s565_s8, %s758_s8   ;;  %s534_s7 = sphi %s563_s7, %s757_s7   ;;  %s530_s6 = sphi %s561_s6, %s756_s6  }
   0x6   : > { %s586_s12 = sadd.s32 1, %s542_s9   ;;  %s24_s13 = sadd.s32 1, %s538_s8 }
   0x7   : > { %s21_s14 = ssub.s32 %s542_s9, %s586_s12  ;;  %p31_p0 = scmp.ne.s32.totalorder %s538_s8, %s534_s7 }
   0x8   : > { %p22_p1 = scmp.eq.s32.totalorder %s21_s14, 0  ;;  %p32_p2 = scmp.eq.s32.totalorder %s542_s9, 0 }
   0x9   : > { %p37_p3 = scmp.ne.s32.totalorder %s534_s7, %s530_s6  ;;  %p38_p4 = scmp.eq.s32.totalorder %s582_s10, 0 }
   0xa   : > { %s598_s15 = scalar_select %p22_p1, %s538_s8, %s24_s13  }
   0xb   : > { %p600_p5 = por %p32_p2, %p31_p0  ;;  %p604_p6 = por %p38_p4, %p37_p3 }
   0xc   : > { %p61_p7 = scmp.eq.s32.totalorder %s582_s10, 1  ;;  %p67_p8 = scmp.eq.s32.totalorder %s378_s11, 1 }
   0xd   : > { %p405_p10 = scmp.lt.s32.totalorder %s542_s9, 2  ;;  %s87_s20 = sand.u32 1, %s538_s8  }
   0xe   : > { %p611_p11 = por %p61_p7, %p31_p0  ;;  %p615_p12 = por %p67_p8, %p37_p3 }
   0xf   : > { %s382_s21 = sshll.u32 %s542_s9, 3  ;;  %s381_s22 = sshll.u32 %s87_s20, 3 }
  0x10   : > { %s95_s25 = scalar_lea.hbm %s746_s0, %s382_s21  ;;  %s91_s27 = scalar_lea.vmem [#allocation2], %s381_s22 }
  0x11   : > { %s97_s26 = sshll.u32 %s95_s25, 4  ;;  %s99_s28 = sshll.u32 %s91_s27, 4  ;;  %s98_s26 = int_to_ptr.hbm [resolvable:$true] %s97_s26  ;;  %s100_s28 = int_to_ptr.vmem [resolvable:$true] %s99_s28 }
  0x12   : > { %p626_p13 = pnand %p405_p10, %p600_p5  ;;  %p383_p0 = scmp.ge.s32.totalorder %s542_s9, 1 }
  0x13   : > { %p104_p1 = scmp.lt.s32.totalorder %s542_s9, 3  ;;  %s88_s30 = scalar_lea.sflag [#allocation3], %s87_s20 }
  0x14   : > { %s446_s2 = sshra.s32 %s98_s26, 4  ;;  %p450_p3 = pneg %p626_p13  ;;  %s447_s2 = int_to_ptr.hbm [resolvable:$true] %s446_s2 }
  0x15   : > { %s448_s3 = scalar_lea.hbm %s447_s2, 8  ;;  %s453_s11 = scalar_lea.hbm %s746_s0, 16 }
  0x16   : > { %p449_p2 = scmp.ne.s32.totalorder %s447_s2, %s448_s3  ;;  %p454_p5 = scmp.lt.s32.totalorder %s447_s2, %s746_s0 }
  0x17   : > { %p455_p8 = scmp.lt.s32.totalorder %s453_s11, %s448_s3 }
  0x18   : > { %p451_p4 = pnand %p450_p3, %p449_p2 }
  0x19   : > { %p456_p10 = por %p455_p8, %p454_p5 }
  0x1a   : > { %p452_p7 = pneg %p451_p4 }
  0x1c   : > { %p457_p9 = pnand %p456_p10, %p452_p7 }
  0x1e   : > { %460 = shalt.err (!%p457_p9)
}
  0x1f   : > { %400 = dma.hbm_to_vmem [thread:$0]  (!%p626_p13), %s98_s26, 128, %s100_s28, %s88_s30  }
  0x20   : > { %p105_p2 = pnand %p383_p0, %p104_p1 }
  0x21   : > { %s647_s16 = sand.u32 (!%p105_p2), 1, %s534_s7  }
  0x22   : > { %108 = sbr.rel (%p105_p2) target bundleno = 144 (0x90), region = 24  ;;  %s384_s20 = sshll.u32 (!%p105_p2), %s647_s16, 3 }
  0x23   : > { %s111_s21 = scalar_lea.sflag (!%p105_p2), [#allocation3], %s647_s16  ;;  %s114_s22 = scalar_lea.vmem (!%p105_p2), [#allocation2], %s384_s20 }
  0x27   : > { %521 = dma.done.wait (%p604_p6), %s111_s21, 128  }
  0x28   : > { %523 = vsyncadd (%p604_p6), %s111_s21, 4294967168  ;;  %v657_v0 = vld [vmem:[%s114_s22] sm:$0xff]  ;;  %v544_v12 = vmov 683565275   ;;  %v545_v14 = vmov 2475754826  }
  0x29   : > { %v138_v1 = vand.u32 2139095040, %v657_v0  ;;  %v135_v3 = vand.u32 2147483647, %v657_v0  ;;  %v546_v16 = vmov 2131351028   ;;  %vm137_vm12 = vcmp.lt.s32.totalorder %v657_v0, 0 }
  0x2a   : > { %v547_v18 = vmov 2102212464   ;;  %v548_v20 = vmov 920167782   ;;  %v549_v26 = vmov 1326507024  }
  0x2b   : > { %v139_v2 = vshrl.u32 %v138_v1, 23  ;;  %v142_v6 = vand.u32 8388607, %v135_v3  ;;  %v550_v1 = vmov 0   ;;  %vm701_vm13 = vcmp.le.f32.partialorder %v135_v3, 0.7853982 }
  0x2c   : > { %s390_s17 = sshll.u32 %s582_s10, 3  ;;  %s133_s26 = scalar_lea.vmem [#allocation5], %s384_s20 }
  0x2d   : > { %v386_v4 = vadd.s32 4294967169, %v139_v2  ;;  %v143_v9 = vor.u32 8388608, %v142_v6  ;;  %s303_s25 = scalar_lea.hbm %s747_s1, %s390_s17  ;;  %s305_s27 = sshll.u32 %s133_s26, 4  ;;  %s306_s27 = int_to_ptr.vmem [resolvable:$true] %s305_s27 }
  0x2e   : > { %s307_s28 = sshll.u32 %s303_s25, 4  ;;  %s293_s10 = scalar_lea.sflag [#allocation4], %s647_s16  ;;  %s308_s28 = int_to_ptr.hbm [resolvable:$true] %s307_s28 }
  0x2f   : > { %v145_v5 = vadd.s32 1, %v386_v4  ;;  %v666_v28 = vshll.u32 %v143_v9, 8  ;;  %s490_s29 = sshra.s32 %s308_s28, 4  ;;  %s496_s4 = scalar_lea.hbm %s747_s1, 16  ;;  %s491_s29 = int_to_ptr.hbm [resolvable:$true] %s490_s29 }
  0x30   : > { %s492_s30 = scalar_lea.hbm %s491_s29, 8  ;;  %p497_p0 = scmp.lt.s32.totalorder %s491_s29, %s747_s1 }
  0x31   : > { %vm146_vm0 = vcmp.gt.s32.totalorder %v145_v5, 0  ;;  %v184_v40 = vand.u32 65535, %v666_v28  ;;  %v185_v41 = vshrl.u32 %v666_v28, 16  ;;  %p493_p6 = scmp.ne.s32.totalorder %s491_s29, %s492_s30  ;;  %p498_p1 = scmp.lt.s32.totalorder %s496_s4, %s492_s30 }
  0x32   : > { %v147_v7 = vsel %vm146_vm0, %v145_v5, 0 }
  0x33   : > { %v149_v8 = vand.u32 31, %v147_v7  ;;  %v663_v10 = vshrl.u32 %v147_v7, 5  ;;  %p494_p9 = pnand %p493_p6, %p611_p11  ;;  %p499_p3 = por %p498_p1, %p497_p0 }
  0x35   : > { %v150_v11 = vsub.s32 32, %v149_v8  ;;  %v152_v13 = vshll.u32 %v544_v12, %v149_v8  ;;  %v155_v15 = vshll.u32 %v545_v14, %v149_v8  ;;  %v158_v17 = vshll.u32 %v546_v16, %v149_v8  ;;  %p495_p13 = pneg %p494_p9 }
  0x36   : > { %v161_v19 = vshll.u32 %v547_v18, %v149_v8  ;;  %v164_v21 = vshll.u32 %v548_v20, %v149_v8  ;;  %vm167_vm1 = vcmp.lt.s32.totalorder %v663_v10, 1  ;;  %vm170_vm2 = vcmp.lt.s32.totalorder %v663_v10, 4 }
  0x37   : > { %v153_v22 = vshrl.u32 %v545_v14, %v150_v11  ;;  %v156_v23 = vshrl.u32 %v546_v16, %v150_v11  ;;  %v159_v24 = vshrl.u32 %v547_v18, %v150_v11  ;;  %v162_v25 = vshrl.u32 %v548_v20, %v150_v11  ;;  %p500_p4 = pnand %p499_p3, %p495_p13 }
  0x38   : > { %v165_v27 = vshrl.u32 %v549_v26, %v150_v11  ;;  %vm169_vm3 = vcmp.lt.s32.totalorder %v663_v10, 3  ;;  %vm168_vm4 = vcmp.lt.s32.totalorder %v663_v10, 2  ;;  %v151_v48 = vshrl.u32 %v544_v12, %v150_v11 }
  0x39   : > { %v154_v29 = vor.u32 %v153_v22, %v152_v13  ;;  %v157_v30 = vor.u32 %v156_v23, %v155_v15  ;;  %v160_v31 = vor.u32 %v159_v24, %v158_v17  ;;  %v163_v32 = vor.u32 %v162_v25, %v161_v19 }
  0x3a   : > { %v166_v33 = vor.u32 %v165_v27, %v164_v21 }
  0x3b   : > { %v175_v34 = vsel %vm167_vm1, %v154_v29, %v157_v30  ;;  %v179_v35 = vsel %vm167_vm1, %v157_v30, %v160_v31  ;;  %v176_v36 = vsel %vm170_vm2, %v163_v32, 920167782  ;;  %v171_v61 = vsel %vm167_vm1, %v151_v48, %v154_v29 }
  0x3c   : > { %v180_v37 = vsel %vm170_vm2, %v166_v33, 1326507024  ;;  %v177_v38 = vsel %vm169_vm3, %v160_v31, %v176_v36  ;;  %v172_v63 = vsel %vm170_vm2, %v160_v31, 2102212464  ;;  %vm278_vm1 = vweird.f32 %v657_v0 }
  0x3d   : > { %v181_v39 = vsel %vm169_vm3, %v163_v32, %v180_v37  ;;  %v178_v42 = vsel %vm168_vm4, %v175_v34, %v177_v38  ;;  %v173_v12 = vsel %vm169_vm3, %v157_v30, %v172_v63 }
  0x3e   : > { %v182_v43 = vsel %vm168_vm4, %v179_v35, %v181_v39  ;;  %v208_v46 = vand.u32 65535, %v178_v42  ;;  %v209_v47 = vshrl.u32 %v178_v42, 16  ;;  %v174_v20 = vsel %vm168_vm4, %v171_v61, %v173_v12 }
  0x3f   : > { %v186_v44 = vand.u32 65535, %v182_v43  ;;  %v187_v45 = vshrl.u32 %v182_v43, 16  ;;  %v228_v24 = vmul.u32 %v666_v28, %v174_v20 }
  0x40   : > { %v210_v52 = vmul.u32 %v208_v46, %v184_v40  ;;  %v211_v53 = vmul.u32 %v209_v47, %v184_v40  ;;  %v212_v54 = vmul.u32 %v208_v46, %v185_v41  ;;  %v213_v58 = vmul.u32 %v209_v47, %v185_v41 }
  0x41   : > { %v188_v49 = vmul.u32 %v186_v44, %v184_v40  ;;  %v189_v50 = vmul.u32 %v187_v45, %v184_v40  ;;  %v190_v51 = vmul.u32 %v186_v44, %v185_v41  ;;  %v191_v55 = vmul.u32 %v187_v45, %v185_v41 }
  0x42   : > { %v214_v59 = vshll.u32 %v211_v53, 16  ;;  %v216_v60 = vshll.u32 %v212_v54, 16  ;;  %v215_v9 = vshrl.u32 %v211_v53, 16  ;;  %v217_v16 = vshrl.u32 %v212_v54, 16 }
  0x43   : > { %v192_v56 = vshll.u32 %v189_v50, 16  ;;  %v194_v57 = vshll.u32 %v190_v51, 16  ;;  %v193_v5 = vshrl.u32 %v189_v50, 16  ;;  %v195_v13 = vshrl.u32 %v190_v51, 16 }
  0x44   : > { %vm218_vm6 = vc.u32 %v210_v52, %v214_v59  ;;  %v220_v4 = vadd.s32 %v214_v59, %v210_v52 }
  0x45   : > { %vm196_vm5 = vc.u32 %v188_v49, %v192_v56  ;;  %v198_v62 = vadd.s32 %v192_v56, %v188_v49  ;;  %v219_v7 = vsel %vm218_vm6, 1, %v550_v1 }
  0x46   : > { %v197_v2 = vsel %vm196_vm5, 1, %v550_v1  ;;  %v221_v11 = vadd.s32 %v219_v7, %v213_v58  ;;  %vm222_vm8 = vc.u32 %v220_v4, %v216_v60  ;;  %v224_v19 = vadd.s32 %v220_v4, %v216_v60 }
  0x47   : > { %v199_v6 = vadd.s32 %v197_v2, %v191_v55  ;;  %vm200_vm7 = vc.u32 %v198_v62, %v194_v57  ;;  %v223_v15 = vsel %vm222_vm8, 1, %v550_v1 }
  0x48   : > { %v201_v8 = vsel %vm200_vm7, 1, %v550_v1  ;;  %v225_v17 = vadd.s32 %v223_v15, %v221_v11 }
  0x49   : > { %v203_v14 = vadd.s32 %v201_v8, %v199_v6 }
  0x4a   : > { %v226_v21 = vadd.s32 %v225_v17, %v215_v9 }
  0x4b   : > { %v204_v18 = vadd.s32 %v203_v14, %v193_v5 }
  0x4c   : > { %v227_v23 = vadd.s32 %v226_v21, %v217_v16 }
  0x4d   : > { %v205_v22 = vadd.s32 %v204_v18, %v195_v13 }
  0x4e   : > { %v231_v25 = vadd.s32 1, %v227_v23 }
  0x4f   : > { %vm230_vm9 = vc.u32 %v205_v22, %v224_v19  ;;  %v229_v10 = vadd.s32 %v224_v19, %v205_v22 }
  0x50   : > { %v232_v26 = vsel %vm230_vm9, %v231_v25, %v227_v23 }
  0x51   : > { %v233_v27 = vadd.s32 %v232_v26, %v228_v24 }
  0x53   : > { %v234_v29 = vadd.s32 536870912, %v233_v27 }
  0x55   : > { %v235_v30 = vshrl.u32 %v234_v29, 30 }
  0x57   : > { %v236_v31 = vshll.u32 %v235_v30, 30  ;;  %v259_v51 = vsub.s32 4, %v235_v30 }
  0x59   : > { %v237_v32 = vsub.s32 %v233_v27, %v236_v31  ;;  %v260_v56 = vsel %vm137_vm12, %v259_v51, %v235_v30 }
  0x5a   : > { %v262_v3 = vsel %vm701_vm13, 0, %v260_v56 }
  0x5b   : > { %vm238_vm10 = vcmp.lt.s32.totalorder %v237_v32, 0  ;;  %v239_v33 = vsub.s32 0, %v237_v32  ;;  %v279_v63 = vand.u32 3, %v262_v3 }
  0x5d   : > { %v240_v34 = vsel %vm238_vm10, %v239_v33, %v237_v32  ;;  %vm284_vm14 = vcmp.eq.s32.totalorder %v279_v63, 2  ;;  %vm281_vm15 = vcmp.eq.s32.totalorder %v279_v63, 0  ;;  %vm280_vm0 = vcmp.lt.s32.totalorder %v279_v63, 2 }
  0x5e   : > { %v241_v35 = vclz %v240_v34 }
  0x60   : > { %v387_v36 = vadd.s32 4294967294, %v241_v35 }
  0x62   : > { %vm388_vm11 = vcmp.lt.s32.totalorder %v387_v36, 0 }
  0x63   : > { %v244_v37 = vsel %vm388_vm11, 0, %v387_v36 }
  0x64   : > { %v245_v38 = vsub.s32 32, %v244_v37  ;;  %v246_v39 = vshll.u32 %v237_v32, %v244_v37  ;;  %v249_v40 = vsub.s32 4294967266, %v244_v37 }
  0x66   : > { %v247_v28 = vshrl.u32 %v229_v10, %v245_v38  ;;  %v250_v41 = vadd.s32 127, %v249_v40 }
  0x68   : > { %v248_v42 = vor.u32 %v247_v28, %v246_v39  ;;  %v251_v43 = vshll.u32 %v250_v41, 23 }
  0x6a   : > { %v252_v44 = vor.u32 4788187, %v251_v43  ;;  %v255_v45 = vcvt.s32.f32 %v248_v42 }
  0x6c   : > { %v253_v46 = vand.u32 2147483647, %v252_v44 }
  0x6e   : > { %v256_v47 = vmul.f32 %v255_v45, %v253_v46 }
  0x70   : > { %v257_v49 = vxor.u32 2147483648, %v256_v47 }
  0x72   : > { %v258_v50 = vsel %vm137_vm12, %v257_v49, %v256_v47 }
  0x73   : > { %v261_v52 = vsel %vm701_vm13, %v657_v0, %v258_v50 }
  0x74   : > { %v263_v53 = vmul.f32 %v261_v52, %v261_v52 }
  0x76   : > { %v264_v54 = vmul.f32 -0.001358992, %v263_v53  ;;  %v271_v55 = vmul.f32 -0.00019511016, %v263_v53 }
  0x78   : > { %v265_v57 = vadd.f32 0.041655596, %v264_v54  ;;  %v272_v58 = vadd.f32 0.008332121, %v271_v55 }
  0x7a   : > { %v266_v59 = vmul.f32 %v265_v57, %v263_v53  ;;  %v273_v60 = vmul.f32 %v272_v58, %v263_v53 }
  0x7c   : > { %v267_v61 = vadd.f32 -0.4999988, %v266_v59  ;;  %v274_v62 = vadd.f32 -0.16666654, %v273_v60 }
  0x7e   : > { %v268_v1 = vmul.f32 %v267_v61, %v263_v53  ;;  %v275_v2 = vmul.f32 %v274_v62, %v263_v53 }
  0x80   : > { %v269_v4 = vadd.f32 1.0, %v268_v1  ;;  %v276_v5 = vadd.f32 1.0, %v275_v2 }
  0x82   : > { %v277_v6 = vmul.f32 %v276_v5, %v261_v52  ;;  %v285_v7 = vxor.u32 2147483648, %v269_v4 }
  0x84   : > { %v282_v8 = vxor.u32 2147483648, %v277_v6  ;;  %v286_v9 = vsel %vm284_vm14, %v285_v7, %v277_v6 }
  0x86   : > { %v283_v11 = vsel %vm281_vm15, %v269_v4, %v282_v8 }
  0x87   : > { %v287_v12 = vsel %vm280_vm0, %v283_v11, %v286_v9 }
  0x88   : > { %v288_v13 = vsel %vm278_vm1, nan, %v287_v12 }
  0x89   : > { %v289_v14 = vsub.f32 1.0, %v288_v13 }
  0x8b   : > { %v290_v15 = vmul.f32 10.3005, %v289_v14 }
  0x8d   : > { %291 = vst [vmem:[%s133_s26] sm:$0xff] %v290_v15 }
  0x8e   : > { %503 = shalt.err (!%p500_p4)
}
  0x8f   : > { %395 = dma.vmem_to_hbm [thread:$0]  (%p611_p11), %s306_s27, 128, %s308_s28, %s293_s10  }
  0x90 PF: > { %s319_s13 = sand.u32 1, %s530_s6   ;;  %p755_p7 = scmp.ge.s32.totalorder %s542_s9, 2 }
  0x91   : > { %s320_s14 = scalar_lea.sflag [#allocation4], %s319_s13 }
  0x92   : > { %p402_p5 = pnand %p755_p7, %p615_p12 }
  0x94   : > { %p403_p8 = pneg %p402_p5 }
  0x96   : > { %525 = dma.done.wait (%p403_p8), %s320_s14, 128  }
  0x97   : > { %527 = vsyncadd (%p403_p8), %s320_s14, 4294967168  ;;  %p14_p10 = scmp.ge.s32.totalorder %s586_s12, 4   ;;  %s756_s6 = smov %s534_s7 }
  0x98   : > { %s757_s7 = smov %s538_s8  ;;  %s758_s8 = smov %s598_s15 }
  0x99   : > { %s759_s9 = smov %s586_s12  ;;  %16 = sbr.rel (!%p14_p10) target bundleno = 5 (0x5), region = 69 }
  0x9e   :  { %326 = vsyncpa [#allocation3], 1 }
  0x9f   :  { %328 = vsyncpa [#allocation3 + $0x1], 1 }
  0xa0   :  { %329 = vsyncpa [#allocation4], 1 }
  0xa1   :  { %331 = vsyncpa [#allocation4 + $0x1], 1 }

</bundles_post_ra>
